<compile_context>
chip_gen: v5e
topology: v5e:2x2
jax: 0.10.0
libtpu: 0.0.40
codegen_flags: <defaults>
</compile_context>

<pallas_src>
import numpy as np
import jax
import jax.numpy as jnp
from jax.experimental import pallas as pl
from jax.experimental.pallas import tpu as pltpu

_LN_EPS = 1e-5  # torch.nn.LayerNorm default


def _round_up(x, m):
    return (x + m - 1) // m * m


def _w_layout(f, dims):
    """Row offsets (all 8-aligned) of the packed weight blocks and total rows."""
    h1, h2, h3, h4 = dims
    rows = (f, f, h1, h2, h3, h4)   # W1_comb, W1_hint, W2, W3, W4, W5
    offs = []
    o = 0
    for r in rows:
        offs.append(o)
        o += _round_up(r, 8)
    return tuple(offs), o


def _ln_relu(z, gamma, beta, n):
    """LayerNorm(last dim) -> affine -> ReLU. One-pass stats (two independent XLU sums)."""
    inv_n = 1.0 / float(n)
    s1 = jnp.sum(z, axis=-1, keepdims=True)
    s2 = jnp.sum(z * z, axis=-1, keepdims=True)
    mu = s1 * inv_n
    var = jnp.maximum(s2 * inv_n - mu * mu, 0.0)   # clamp rounding-induced negatives
    zn = (z - mu) * jax.lax.rsqrt(var + _LN_EPS)
    return jnp.maximum(zn * gamma + beta, 0.0)


def _make_kernel(f, dims):
    h1, h2, h3, h4 = dims
    (o_w1c, o_w1h, o_w2, o_w3, o_w4, o_w5), _ = _w_layout(f, dims)
    # rows of the packed vector slab:
    #   0:b1 1:g1 2:be1 | 3:b2 4:g2 5:be2 | 6:b3 7:g3 8:be3 | 9:b4 10:g4 11:be4 | 12:b5

    def kernel(comb_ref, hint_ref, w_ref, v_ref, out_ref):
        # Slice refs at point of use: each weight block / vector is loaded right
        # before its dot/add and dies immediately after (no slab-wide live range).
        def vec(row, n):
            return v_ref[row:row + 1, :n]

        # Layer 1: W1 consumed as two row blocks -> no lane-axis concat of inputs.
        z = (jnp.dot(comb_ref[...], w_ref[o_w1c:o_w1c + f, :h1],
                     preferred_element_type=jnp.float32)
             + jnp.dot(hint_ref[...], w_ref[o_w1h:o_w1h + f, :h1],
                       preferred_element_type=jnp.float32)
             + vec(0, h1))
        h = _ln_relu(z, vec(1, h1), vec(2, h1), h1)

        z = jnp.dot(h, w_ref[o_w2:o_w2 + h1, :h2],
                    preferred_element_type=jnp.float32) + vec(3, h2)
        h = _ln_relu(z, vec(4, h2), vec(5, h2), h2)

        z = jnp.dot(h, w_ref[o_w3:o_w3 + h2, :h3],
                    preferred_element_type=jnp.float32) + vec(6, h3)
        h = _ln_relu(z, vec(7, h3), vec(8, h3), h3)

        z = jnp.dot(h, w_ref[o_w4:o_w4 + h3, :h4],
                    preferred_element_type=jnp.float32) + vec(9, h4)
        h = _ln_relu(z, vec(10, h4), vec(11, h4), h4)

        logits = jnp.dot(h, w_ref[o_w5:o_w5 + h4, :f],
                         preferred_element_type=jnp.float32) + vec(12, f)
        out_ref[...] = jax.nn.sigmoid(logits).astype(out_ref.dtype)

    return kernel


def pack_params(params, f, dims):
    """Pack 18 small parameter tensors into two VMEM-friendly slabs (done once).

    Each weight block is padded to a multiple of 8 rows so all in-kernel row
    slices start on (8,128)-tile boundaries; columns are padded to Hmax (lane
    padding would happen anyway).
    """
    h1, h2, h3, h4 = dims
    hmax = max(h1, h2, h3, h4, f)

    def pad_block(a):
        r, c = a.shape
        return jnp.pad(a, ((0, _round_up(r, 8) - r), (0, hmax - c)))

    w1 = params["w1"]
    wslab = jnp.concatenate(
        [pad_block(w1[:f]),        # W1 rows acting on `combined`
         pad_block(w1[f:2 * f]),   # W1 rows acting on `hint`
         pad_block(params["w2"]), pad_block(params["w3"]),
         pad_block(params["w4"]), pad_block(params["w5"])], axis=0)

    vec_rows = [params["b1"], params["g1"], params["be1"],
                params["b2"], params["g2"], params["be2"],
                params["b3"], params["g3"], params["be3"],
                params["b4"], params["g4"], params["be4"],
                params["b5"]]
    vecs = jnp.concatenate(
        [jnp.pad(v, ((0, 0), (0, hmax - v.shape[1]))) for v in vec_rows], axis=0)
    vecs = jnp.pad(vecs, ((0, _round_up(vecs.shape[0], 8) - vecs.shape[0]), (0, 0)))
    return wslab, vecs


def _choose_bm(b):
    """Batch tile: vreg-safe cap at 128; >= 2 grid blocks whenever batch allows,
    so v7x's two TensorCores both get work; tiny batches stay a single block."""
    if b <= 16:
        return _round_up(b, 8)
    return min(128, _round_up(pl.cdiv(b, 2), 8))


def discriminator_forward(features_combined, hint, wslab, vecs, f, dims):
    b = features_combined.shape[0]
    h1, h2, h3, h4 = dims

    bm = _choose_bm(b)
    b_pad = _round_up(b, bm)
    if b_pad != b:
        pad = b_pad - b
        features_combined = jnp.pad(features_combined, ((0, pad), (0, 0)))
        hint = jnp.pad(hint, ((0, pad), (0, 0)))
    grid = (b_pad // bm,)

    flops = 2 * b_pad * (2 * f * h1 + h1 * h2 + h2 * h3 + h3 * h4 + h4 * f)
    transcendentals = b_pad * (4 + f)            # 4 rsqrt + F sigmoid per row (approx)
    bytes_accessed = 4 * (3 * b_pad * f + wslab.size + vecs.size)

    kernel = _make_kernel(f, dims)
    out = pl.pallas_call(
        kernel,
        out_shape=jax.ShapeDtypeStruct((b_pad, f), jnp.float32),
        grid=grid,
        in_specs=[
            pl.BlockSpec((bm, f), lambda i: (i, 0)),
            pl.BlockSpec((bm, f), lambda i: (i, 0)),
            pl.BlockSpec(wslab.shape, lambda i: (0, 0)),   # weights resident across tiles
            pl.BlockSpec(vecs.shape, lambda i: (0, 0)),
        ],
        out_specs=pl.BlockSpec((bm, f), lambda i: (i, 0)),
        compiler_params=pltpu.CompilerParams(dimension_semantics=("parallel",)),
        cost_estimate=pl.CostEstimate(flops=flops,
                                      transcendentals=transcendentals,
                                      bytes_accessed=bytes_accessed),
    )(features_combined, hint, wslab, vecs)
    return out[:b]


def make_params(number_features, h1, h2, h3, h4, seed=0):
    """Deterministic xavier-style init matching the torch module's shapes."""
    rng = np.random.RandomState(seed)

    def xavier(size):
        std = 1.0 / np.sqrt(size[0] / 2.0)
        return rng.normal(size=size, scale=std).astype(np.float32)

    p = {
        "w1": xavier([number_features * 2, h1]),
        "w2": xavier([h1, h2]),
        "w3": xavier([h2, h3]),
        "w4": xavier([h3, h4]),
        "w5": xavier([h4, number_features]),
        "b1": np.zeros((1, h1), np.float32),
        "b2": np.zeros((1, h2), np.float32),
        "b3": np.zeros((1, h3), np.float32),
        "b4": np.zeros((1, h4), np.float32),
        "b5": np.zeros((1, number_features), np.float32),
        # LayerNorm affine params (torch init: weight=1, bias=0)
        "g1": np.ones((1, h1), np.float32), "be1": np.zeros((1, h1), np.float32),
        "g2": np.ones((1, h2), np.float32), "be2": np.zeros((1, h2), np.float32),
        "g3": np.ones((1, h3), np.float32), "be3": np.zeros((1, h3), np.float32),
        "g4": np.ones((1, h4), np.float32), "be4": np.zeros((1, h4), np.float32),
    }
    return {k: jnp.asarray(v) for k, v in p.items()}


def _reference(features_combined, hint, params):
    """Pure-JAX reference (torch-style two-pass LayerNorm)."""
    x = jnp.concatenate([features_combined, hint], axis=1)

    def layer(hh, w, b, g, be):
        z = hh @ w + b
        mu = jnp.mean(z, axis=-1, keepdims=True)
        var = jnp.mean((z - mu) ** 2, axis=-1, keepdims=True)
        zn = (z - mu) / jnp.sqrt(var + _LN_EPS) * g + be
        return jax.nn.relu(zn)

    hh = layer(x, params["w1"], params["b1"], params["g1"], params["be1"])
    hh = layer(hh, params["w2"], params["b2"], params["g2"], params["be2"])
    hh = layer(hh, params["w3"], params["b3"], params["g3"], params["be3"])
    hh = layer(hh, params["w4"], params["b4"], params["g4"], params["be4"])
    return jax.nn.sigmoid(hh @ params["w5"] + params["b5"])


if __name__ == "__main__":
    F = 16             # number_features
    H1 = H2 = H3 = H4 = 32
    dims = (H1, H2, H3, H4)

    params = make_params(F, H1, H2, H3, H4, seed=0)
    wslab, vecs = pack_params(params, F, dims)   # one-time packing: 20 operands -> 4

    key = jax.random.PRNGKey(0)

    # Small batch (single grid block).
    B = 8
    k_data, k_hint, key = jax.random.split(key, 3)[0], jax.random.split(key, 3)[1], jax.random.split(key, 3)[2]
    features_combined = jax.random.normal(k_data, (B, F), dtype=jnp.float32)
    hint = (jax.random.uniform(k_hint, (B, F)) > 0.5).astype(jnp.float32)
    d_prob = jax.block_until_ready(
        discriminator_forward(features_combined, hint, wslab, vecs, F, dims))
    ref = _reference(features_combined, hint, params)
    np.testing.assert_allclose(np.asarray(d_prob), np.asarray(ref), rtol=1e-4, atol=1e-5)

    # Larger, non-multiple batch: exercises cdiv grid + padding + megacore sharding.
    B2 = 300
    k_data2, k_hint2 = jax.random.split(key)
    fc2 = jax.random.normal(k_data2, (B2, F), dtype=jnp.float32)
    hint2 = (jax.random.uniform(k_hint2, (B2, F)) > 0.5).astype(jnp.float32)
    d_prob2 = jax.block_until_ready(
        discriminator_forward(fc2, hint2, wslab, vecs, F, dims))
    ref2 = _reference(fc2, hint2, params)
    np.testing.assert_allclose(np.asarray(d_prob2), np.asarray(ref2), rtol=1e-4, atol=1e-5)

    print("KERNEL_OK")
</pallas_src>

<mosaic_0001>
module attributes {stable_mosaic.version = 11 : i64} {
  func.func @kernel(%arg0: i32, %arg1: memref<8x16xf32, #tpu.memory_space<vmem>>, %arg2: memref<8x16xf32, #tpu.memory_space<vmem>>, %arg3: memref<160x32xf32, #tpu.memory_space<vmem>>, %arg4: memref<16x32xf32, #tpu.memory_space<vmem>>, %arg5: memref<8x16xf32, #tpu.memory_space<vmem>>) attributes {dimension_semantics = [#tpu.dimension_semantics<parallel>], iteration_bounds = array<i64: 1>, scalar_prefetch = 0 : i64, scratch_operands = 0 : i64, tpu.core_type = #tpu.core_type<tc>, window_params = [{transform_indices = @transform_0, window_bounds = array<i64: 8, 16>}, {transform_indices = @transform_1, window_bounds = array<i64: 8, 16>}, {pipeline_mode = #tpu.pipeline_mode<synchronous>, transform_indices = @transform_2, window_bounds = array<i64: 160, 32>}, {pipeline_mode = #tpu.pipeline_mode<synchronous>, transform_indices = @transform_3, window_bounds = array<i64: 16, 32>}, {transform_indices = @transform_4, window_bounds = array<i64: 8, 16>}]} {
    %c0 = arith.constant 0 : index
    %c0_0 = arith.constant 0 : index
    %0 = vector.load %arg1[%c0, %c0_0] : memref<8x16xf32, #tpu.memory_space<vmem>>, vector<8x16xf32>
    %c0_1 = arith.constant 0 : index
    %c0_2 = arith.constant 0 : index
    %1 = vector.load %arg3[%c0_1, %c0_2] : memref<160x32xf32, #tpu.memory_space<vmem>>, vector<16x32xf32>
    %cst = arith.constant dense<0.000000e+00> : vector<8x32xf32>
    %2 = tpu.matmul %0, %1, %cst {dimension_numbers = #tpu.dot_dimension_numbers<[1], [0], [0], [1], [0, 0, 1, 1], [], []>} : vector<8x16xf32>, vector<16x32xf32>, vector<8x32xf32> -> vector<8x32xf32>
    %c0_3 = arith.constant 0 : index
    %c0_4 = arith.constant 0 : index
    %3 = vector.load %arg2[%c0_3, %c0_4] : memref<8x16xf32, #tpu.memory_space<vmem>>, vector<8x16xf32>
    %c16 = arith.constant 16 : index
    %c0_5 = arith.constant 0 : index
    %4 = vector.load %arg3[%c16, %c0_5] : memref<160x32xf32, #tpu.memory_space<vmem>>, vector<16x32xf32>
    %cst_6 = arith.constant dense<0.000000e+00> : vector<8x32xf32>
    %5 = tpu.matmul %3, %4, %cst_6 {dimension_numbers = #tpu.dot_dimension_numbers<[1], [0], [0], [1], [0, 0, 1, 1], [], []>} : vector<8x16xf32>, vector<16x32xf32>, vector<8x32xf32> -> vector<8x32xf32>
    %6 = arith.addf %2, %5 : vector<8x32xf32>
    %c0_7 = arith.constant 0 : index
    %c0_8 = arith.constant 0 : index
    %7 = vector.load %arg4[%c0_7, %c0_8] : memref<16x32xf32, #tpu.memory_space<vmem>>, vector<1x32xf32>
    %8 = vector.broadcast %7 : vector<1x32xf32> to vector<8x32xf32>
    %9 = arith.addf %6, %8 : vector<8x32xf32>
    %c1 = arith.constant 1 : index
    %c0_9 = arith.constant 0 : index
    %10 = vector.load %arg4[%c1, %c0_9] : memref<16x32xf32, #tpu.memory_space<vmem>>, vector<1x32xf32>
    %c2 = arith.constant 2 : index
    %c0_10 = arith.constant 0 : index
    %11 = vector.load %arg4[%c2, %c0_10] : memref<16x32xf32, #tpu.memory_space<vmem>>, vector<1x32xf32>
    %cst_11 = arith.constant dense<0.000000e+00> : vector<8xf32>
    %12 = vector.multi_reduction <add>, %9, %cst_11 [1] : vector<8x32xf32> to vector<8xf32>
    %13 = vector.shape_cast %12 : vector<8xf32> to vector<8x1xf32>
    %14 = arith.mulf %9, %9 : vector<8x32xf32>
    %cst_12 = arith.constant dense<0.000000e+00> : vector<8xf32>
    %15 = vector.multi_reduction <add>, %14, %cst_12 [1] : vector<8x32xf32> to vector<8xf32>
    %16 = vector.shape_cast %15 : vector<8xf32> to vector<8x1xf32>
    %cst_13 = arith.constant 3.125000e-02 : f32
    %17 = vector.broadcast %cst_13 : f32 to vector<8x1xf32>
    %18 = arith.mulf %13, %17 : vector<8x1xf32>
    %cst_14 = arith.constant 3.125000e-02 : f32
    %19 = vector.broadcast %cst_14 : f32 to vector<8x1xf32>
    %20 = arith.mulf %16, %19 : vector<8x1xf32>
    %21 = arith.mulf %18, %18 : vector<8x1xf32>
    %22 = arith.subf %20, %21 : vector<8x1xf32>
    %cst_15 = arith.constant 0.000000e+00 : f32
    %23 = vector.broadcast %cst_15 : f32 to vector<8x1xf32>
    %24 = arith.maximumf %22, %23 : vector<8x1xf32>
    %25 = vector.broadcast %18 : vector<8x1xf32> to vector<8x32xf32>
    %26 = arith.subf %9, %25 : vector<8x32xf32>
    %cst_16 = arith.constant 9.99999974E-6 : f32
    %27 = vector.broadcast %cst_16 : f32 to vector<8x1xf32>
    %28 = arith.addf %24, %27 : vector<8x1xf32>
    %29 = math.rsqrt %28 : vector<8x1xf32>
    %30 = vector.broadcast %29 : vector<8x1xf32> to vector<8x32xf32>
    %31 = arith.mulf %26, %30 : vector<8x32xf32>
    %32 = vector.broadcast %10 : vector<1x32xf32> to vector<8x32xf32>
    %33 = arith.mulf %31, %32 : vector<8x32xf32>
    %34 = vector.broadcast %11 : vector<1x32xf32> to vector<8x32xf32>
    %35 = arith.addf %33, %34 : vector<8x32xf32>
    %cst_17 = arith.constant 0.000000e+00 : f32
    %36 = vector.broadcast %cst_17 : f32 to vector<8x32xf32>
    %37 = arith.maximumf %35, %36 : vector<8x32xf32>
    %c32 = arith.constant 32 : index
    %c0_18 = arith.constant 0 : index
    %38 = vector.load %arg3[%c32, %c0_18] : memref<160x32xf32, #tpu.memory_space<vmem>>, vector<32x32xf32>
    %cst_19 = arith.constant dense<0.000000e+00> : vector<8x32xf32>
    %39 = tpu.matmul %37, %38, %cst_19 {dimension_numbers = #tpu.dot_dimension_numbers<[1], [0], [0], [1], [0, 0, 1, 1], [], []>} : vector<8x32xf32>, vector<32x32xf32>, vector<8x32xf32> -> vector<8x32xf32>
    %c3 = arith.constant 3 : index
    %c0_20 = arith.constant 0 : index
    %40 = vector.load %arg4[%c3, %c0_20] : memref<16x32xf32, #tpu.memory_space<vmem>>, vector<1x32xf32>
    %41 = vector.broadcast %40 : vector<1x32xf32> to vector<8x32xf32>
    %42 = arith.addf %39, %41 : vector<8x32xf32>
    %c4 = arith.constant 4 : index
    %c0_21 = arith.constant 0 : index
    %43 = vector.load %arg4[%c4, %c0_21] : memref<16x32xf32, #tpu.memory_space<vmem>>, vector<1x32xf32>
    %c5 = arith.constant 5 : index
    %c0_22 = arith.constant 0 : index
    %44 = vector.load %arg4[%c5, %c0_22] : memref<16x32xf32, #tpu.memory_space<vmem>>, vector<1x32xf32>
    %cst_23 = arith.constant dense<0.000000e+00> : vector<8xf32>
    %45 = vector.multi_reduction <add>, %42, %cst_23 [1] : vector<8x32xf32> to vector<8xf32>
    %46 = vector.shape_cast %45 : vector<8xf32> to vector<8x1xf32>
    %47 = arith.mulf %42, %42 : vector<8x32xf32>
    %cst_24 = arith.constant dense<0.000000e+00> : vector<8xf32>
    %48 = vector.multi_reduction <add>, %47, %cst_24 [1] : vector<8x32xf32> to vector<8xf32>
    %49 = vector.shape_cast %48 : vector<8xf32> to vector<8x1xf32>
    %cst_25 = arith.constant 3.125000e-02 : f32
    %50 = vector.broadcast %cst_25 : f32 to vector<8x1xf32>
    %51 = arith.mulf %46, %50 : vector<8x1xf32>
    %cst_26 = arith.constant 3.125000e-02 : f32
    %52 = vector.broadcast %cst_26 : f32 to vector<8x1xf32>
    %53 = arith.mulf %49, %52 : vector<8x1xf32>
    %54 = arith.mulf %51, %51 : vector<8x1xf32>
    %55 = arith.subf %53, %54 : vector<8x1xf32>
    %cst_27 = arith.constant 0.000000e+00 : f32
    %56 = vector.broadcast %cst_27 : f32 to vector<8x1xf32>
    %57 = arith.maximumf %55, %56 : vector<8x1xf32>
    %58 = vector.broadcast %51 : vector<8x1xf32> to vector<8x32xf32>
    %59 = arith.subf %42, %58 : vector<8x32xf32>
    %cst_28 = arith.constant 9.99999974E-6 : f32
    %60 = vector.broadcast %cst_28 : f32 to vector<8x1xf32>
    %61 = arith.addf %57, %60 : vector<8x1xf32>
    %62 = math.rsqrt %61 : vector<8x1xf32>
    %63 = vector.broadcast %62 : vector<8x1xf32> to vector<8x32xf32>
    %64 = arith.mulf %59, %63 : vector<8x32xf32>
    %65 = vector.broadcast %43 : vector<1x32xf32> to vector<8x32xf32>
    %66 = arith.mulf %64, %65 : vector<8x32xf32>
    %67 = vector.broadcast %44 : vector<1x32xf32> to vector<8x32xf32>
    %68 = arith.addf %66, %67 : vector<8x32xf32>
    %cst_29 = arith.constant 0.000000e+00 : f32
    %69 = vector.broadcast %cst_29 : f32 to vector<8x32xf32>
    %70 = arith.maximumf %68, %69 : vector<8x32xf32>
    %c64 = arith.constant 64 : index
    %c0_30 = arith.constant 0 : index
    %71 = vector.load %arg3[%c64, %c0_30] : memref<160x32xf32, #tpu.memory_space<vmem>>, vector<32x32xf32>
    %cst_31 = arith.constant dense<0.000000e+00> : vector<8x32xf32>
    %72 = tpu.matmul %70, %71, %cst_31 {dimension_numbers = #tpu.dot_dimension_numbers<[1], [0], [0], [1], [0, 0, 1, 1], [], []>} : vector<8x32xf32>, vector<32x32xf32>, vector<8x32xf32> -> vector<8x32xf32>
    %c6 = arith.constant 6 : index
    %c0_32 = arith.constant 0 : index
    %73 = vector.load %arg4[%c6, %c0_32] : memref<16x32xf32, #tpu.memory_space<vmem>>, vector<1x32xf32>
    %74 = vector.broadcast %73 : vector<1x32xf32> to vector<8x32xf32>
    %75 = arith.addf %72, %74 : vector<8x32xf32>
    %c7 = arith.constant 7 : index
    %c0_33 = arith.constant 0 : index
    %76 = vector.load %arg4[%c7, %c0_33] : memref<16x32xf32, #tpu.memory_space<vmem>>, vector<1x32xf32>
    %c8 = arith.constant 8 : index
    %c0_34 = arith.constant 0 : index
    %77 = vector.load %arg4[%c8, %c0_34] : memref<16x32xf32, #tpu.memory_space<vmem>>, vector<1x32xf32>
    %cst_35 = arith.constant dense<0.000000e+00> : vector<8xf32>
    %78 = vector.multi_reduction <add>, %75, %cst_35 [1] : vector<8x32xf32> to vector<8xf32>
    %79 = vector.shape_cast %78 : vector<8xf32> to vector<8x1xf32>
    %80 = arith.mulf %75, %75 : vector<8x32xf32>
    %cst_36 = arith.constant dense<0.000000e+00> : vector<8xf32>
    %81 = vector.multi_reduction <add>, %80, %cst_36 [1] : vector<8x32xf32> to vector<8xf32>
    %82 = vector.shape_cast %81 : vector<8xf32> to vector<8x1xf32>
    %cst_37 = arith.constant 3.125000e-02 : f32
    %83 = vector.broadcast %cst_37 : f32 to vector<8x1xf32>
    %84 = arith.mulf %79, %83 : vector<8x1xf32>
    %cst_38 = arith.constant 3.125000e-02 : f32
    %85 = vector.broadcast %cst_38 : f32 to vector<8x1xf32>
    %86 = arith.mulf %82, %85 : vector<8x1xf32>
    %87 = arith.mulf %84, %84 : vector<8x1xf32>
    %88 = arith.subf %86, %87 : vector<8x1xf32>
    %cst_39 = arith.constant 0.000000e+00 : f32
    %89 = vector.broadcast %cst_39 : f32 to vector<8x1xf32>
    %90 = arith.maximumf %88, %89 : vector<8x1xf32>
    %91 = vector.broadcast %84 : vector<8x1xf32> to vector<8x32xf32>
    %92 = arith.subf %75, %91 : vector<8x32xf32>
    %cst_40 = arith.constant 9.99999974E-6 : f32
    %93 = vector.broadcast %cst_40 : f32 to vector<8x1xf32>
    %94 = arith.addf %90, %93 : vector<8x1xf32>
    %95 = math.rsqrt %94 : vector<8x1xf32>
    %96 = vector.broadcast %95 : vector<8x1xf32> to vector<8x32xf32>
    %97 = arith.mulf %92, %96 : vector<8x32xf32>
    %98 = vector.broadcast %76 : vector<1x32xf32> to vector<8x32xf32>
    %99 = arith.mulf %97, %98 : vector<8x32xf32>
    %100 = vector.broadcast %77 : vector<1x32xf32> to vector<8x32xf32>
    %101 = arith.addf %99, %100 : vector<8x32xf32>
    %cst_41 = arith.constant 0.000000e+00 : f32
    %102 = vector.broadcast %cst_41 : f32 to vector<8x32xf32>
    %103 = arith.maximumf %101, %102 : vector<8x32xf32>
    %c96 = arith.constant 96 : index
    %c0_42 = arith.constant 0 : index
    %104 = vector.load %arg3[%c96, %c0_42] : memref<160x32xf32, #tpu.memory_space<vmem>>, vector<32x32xf32>
    %cst_43 = arith.constant dense<0.000000e+00> : vector<8x32xf32>
    %105 = tpu.matmul %103, %104, %cst_43 {dimension_numbers = #tpu.dot_dimension_numbers<[1], [0], [0], [1], [0, 0, 1, 1], [], []>} : vector<8x32xf32>, vector<32x32xf32>, vector<8x32xf32> -> vector<8x32xf32>
    %c9 = arith.constant 9 : index
    %c0_44 = arith.constant 0 : index
    %106 = vector.load %arg4[%c9, %c0_44] : memref<16x32xf32, #tpu.memory_space<vmem>>, vector<1x32xf32>
    %107 = vector.broadcast %106 : vector<1x32xf32> to vector<8x32xf32>
    %108 = arith.addf %105, %107 : vector<8x32xf32>
    %c10 = arith.constant 10 : index
    %c0_45 = arith.constant 0 : index
    %109 = vector.load %arg4[%c10, %c0_45] : memref<16x32xf32, #tpu.memory_space<vmem>>, vector<1x32xf32>
    %c11 = arith.constant 11 : index
    %c0_46 = arith.constant 0 : index
    %110 = vector.load %arg4[%c11, %c0_46] : memref<16x32xf32, #tpu.memory_space<vmem>>, vector<1x32xf32>
    %cst_47 = arith.constant dense<0.000000e+00> : vector<8xf32>
    %111 = vector.multi_reduction <add>, %108, %cst_47 [1] : vector<8x32xf32> to vector<8xf32>
    %112 = vector.shape_cast %111 : vector<8xf32> to vector<8x1xf32>
    %113 = arith.mulf %108, %108 : vector<8x32xf32>
    %cst_48 = arith.constant dense<0.000000e+00> : vector<8xf32>
    %114 = vector.multi_reduction <add>, %113, %cst_48 [1] : vector<8x32xf32> to vector<8xf32>
    %115 = vector.shape_cast %114 : vector<8xf32> to vector<8x1xf32>
    %cst_49 = arith.constant 3.125000e-02 : f32
    %116 = vector.broadcast %cst_49 : f32 to vector<8x1xf32>
    %117 = arith.mulf %112, %116 : vector<8x1xf32>
    %cst_50 = arith.constant 3.125000e-02 : f32
    %118 = vector.broadcast %cst_50 : f32 to vector<8x1xf32>
    %119 = arith.mulf %115, %118 : vector<8x1xf32>
    %120 = arith.mulf %117, %117 : vector<8x1xf32>
    %121 = arith.subf %119, %120 : vector<8x1xf32>
    %cst_51 = arith.constant 0.000000e+00 : f32
    %122 = vector.broadcast %cst_51 : f32 to vector<8x1xf32>
    %123 = arith.maximumf %121, %122 : vector<8x1xf32>
    %124 = vector.broadcast %117 : vector<8x1xf32> to vector<8x32xf32>
    %125 = arith.subf %108, %124 : vector<8x32xf32>
    %cst_52 = arith.constant 9.99999974E-6 : f32
    %126 = vector.broadcast %cst_52 : f32 to vector<8x1xf32>
    %127 = arith.addf %123, %126 : vector<8x1xf32>
    %128 = math.rsqrt %127 : vector<8x1xf32>
    %129 = vector.broadcast %128 : vector<8x1xf32> to vector<8x32xf32>
    %130 = arith.mulf %125, %129 : vector<8x32xf32>
    %131 = vector.broadcast %109 : vector<1x32xf32> to vector<8x32xf32>
    %132 = arith.mulf %130, %131 : vector<8x32xf32>
    %133 = vector.broadcast %110 : vector<1x32xf32> to vector<8x32xf32>
    %134 = arith.addf %132, %133 : vector<8x32xf32>
    %cst_53 = arith.constant 0.000000e+00 : f32
    %135 = vector.broadcast %cst_53 : f32 to vector<8x32xf32>
    %136 = arith.maximumf %134, %135 : vector<8x32xf32>
    %c128 = arith.constant 128 : index
    %c0_54 = arith.constant 0 : index
    %137 = vector.load %arg3[%c128, %c0_54] : memref<160x32xf32, #tpu.memory_space<vmem>>, vector<32x16xf32>
    %cst_55 = arith.constant dense<0.000000e+00> : vector<8x16xf32>
    %138 = tpu.matmul %136, %137, %cst_55 {dimension_numbers = #tpu.dot_dimension_numbers<[1], [0], [0], [1], [0, 0, 1, 1], [], []>} : vector<8x32xf32>, vector<32x16xf32>, vector<8x16xf32> -> vector<8x16xf32>
    %c12 = arith.constant 12 : index
    %c0_56 = arith.constant 0 : index
    %139 = vector.load %arg4[%c12, %c0_56] : memref<16x32xf32, #tpu.memory_space<vmem>>, vector<1x16xf32>
    %140 = vector.broadcast %139 : vector<1x16xf32> to vector<8x16xf32>
    %141 = arith.addf %138, %140 : vector<8x16xf32>
    %142 = arith.negf %141 : vector<8x16xf32>
    %143 = math.exp %142 : vector<8x16xf32>
    %cst_57 = arith.constant 1.000000e+00 : f32
    %144 = vector.broadcast %cst_57 : f32 to vector<8x16xf32>
    %145 = arith.addf %144, %143 : vector<8x16xf32>
    %146 = arith.divf %144, %145 : vector<8x16xf32>
    %c0_58 = arith.constant 0 : index
    %c0_59 = arith.constant 0 : index
    %147 = vector.load %arg5[%c0_58, %c0_59] : memref<8x16xf32, #tpu.memory_space<vmem>>, vector<8x16xf32>
    tpu.vector_store %arg5[%c0_58, %c0_59], %146 {strides = array<i32>} : memref<8x16xf32, #tpu.memory_space<vmem>>, vector<8x16xf32>,
    return
  }
  func.func @transform_0(%arg0: i32) -> (i32, i32) {
    %c0_i32 = arith.constant 0 : i32
    %c0_i32_0 = arith.constant 0 : i32
    return %arg0, %c0_i32 : i32, i32
  }
  func.func @transform_1(%arg0: i32) -> (i32, i32) {
    %c0_i32 = arith.constant 0 : i32
    %c0_i32_0 = arith.constant 0 : i32
    return %arg0, %c0_i32 : i32, i32
  }
  func.func @transform_2(%arg0: i32) -> (i32, i32) {
    %c0_i32 = arith.constant 0 : i32
    %c0_i32_0 = arith.constant 0 : i32
    %c0_i32_1 = arith.constant 0 : i32
    return %c0_i32, %c0_i32_0 : i32, i32
  }
  func.func @transform_3(%arg0: i32) -> (i32, i32) {
    %c0_i32 = arith.constant 0 : i32
    %c0_i32_0 = arith.constant 0 : i32
    %c0_i32_1 = arith.constant 0 : i32
    return %c0_i32, %c0_i32_0 : i32, i32
  }
  func.func @transform_4(%arg0: i32) -> (i32, i32) {
    %c0_i32 = arith.constant 0 : i32
    %c0_i32_0 = arith.constant 0 : i32
    return %arg0, %c0_i32 : i32, i32
  }
}

</mosaic_0001>

<bundles_post_ra>
// kernel: tpu_custom_call.1
= control target key start
LH: loop header
LB: loop body
LE: loop exit
PB: predicated region body
PF: predicated region fallthrough
CT: control target
= control target key end

     0   :  { %vm24_vm0 = vcmask 130048   ;;  %s563_s0 = inlined_call_operand.vmem [shape: f32[8,16], index: 0, kind: input, shape index: {}]   ;;  %s564_s1 = inlined_call_operand.vmem [shape: f32[8,16], index: 1, kind: input, shape index: {}]   ;;  %s565_s2 = inlined_call_operand.vmem [shape: f32[160,32], index: 2, kind: input, shape index: {}]   ;;  %s566_s3 = inlined_call_operand.vmem [shape: f32[16,32], index: 3, kind: input, shape index: {}]   ;;  %s567_s4 = inlined_call_operand.hbm [shape: f32[8,16], index: 4, kind: output, shape index: {}]  }
   0x1   :  { %v23_v0 = vld [vmem:[%s565_s2 + $0x18] sm:$0xff]  ;;  %v20_v1 = vld [vmem:[%s565_s2 + $0x8] sm:$0xff]  ;;  %v22_v2 = vld [vmem:[%s565_s2 + $0x10] sm:$0xff] }
   0x2   :  { %42 = vmatpush.msra.mxu0 %v23_v0  ;;  %65 = vmatpush.msra.mxu1 %v20_v1  ;;  %v19_v3 = vld [vmem:[%s565_s2] sm:$0xff] }
   0x3   :  { %v21_v4 = vld [vmem:[%s564_s1] sm:$0xff] }
   0x4   :  { %v18_v5 = vld [vmem:[%s563_s0] sm:$0xff]  ;;  %43 = vmatpush.msra.mxu0 %v22_v2  ;;  %66 = vmatpush.msra.mxu1 %v19_v3 }
   0x5   :  { %355 = vmatmul.msk.f32.vlgmr.msra.gmra.mxu0 %vm24_vm0, %v21_v4  ;;  %356 = vmatmul.msk.f32.vlgmr.msra.gmra.mxu1 %vm24_vm0, %v18_v5 }
   0x6   :  { %9 = vsyncpa [#allocation3], 0  ;;  %v363_v6 = vld [vmem:[%s566_s3] ss:$0 sm:$0xff]  ;;  %vm76_vm1 = vcmask 261120   ;;  %v110_v15 = vld [vmem:[%s565_s2 + $0x38] sm:$0xff] }
   0x7   :  { %v109_v16 = vld [vmem:[%s565_s2 + $0x30] sm:$0xff]  ;;  %128 = vmatpush.msra.mxu2 %v110_v15  ;;  %v108_v17 = vld [vmem:[%s565_s2 + $0x28] sm:$0xff]  ;;  %v107_v18 = vld [vmem:[%s565_s2 + $0x20] sm:$0xff]  ;;  %s414_s28 = smov [#allocation2]  }
   0x8   :  { %v364_v33 = vld [vmem:[%s566_s3 + $0x1] ss:$0 sm:$0xff]  ;;  %v365_v36 = vld [vmem:[%s566_s3 + $0x2] ss:$0 sm:$0xff]  ;;  %v366_v40 = vld [vmem:[%s566_s3 + $0x3] ss:$0 sm:$0xff] }
   0x9   :  { %129 = vmatpush.msra.mxu2 %v109_v16  ;;  %v171_v47 = vld [vmem:[%s565_s2 + $0x58] sm:$0xff]  ;;  %v170_v48 = vld [vmem:[%s565_s2 + $0x50] sm:$0xff]  ;;  %v169_v49 = vld [vmem:[%s565_s2 + $0x48] sm:$0xff]  ;;  %s344_s0 = sshll.u32 %s414_s28, 4  ;;  %s345_s0 = int_to_ptr.vmem [resolvable:$true] %s344_s0 }
   0xa   :  { %189 = vmatpush.msra.mxu3 %v171_v47  ;;  %v168_v50 = vld [vmem:[%s565_s2 + $0x40] sm:$0xff]  ;;  %v232_v15 = vld [vmem:[%s565_s2 + $0x78] sm:$0xff]  ;;  %v231_v16 = vld [vmem:[%s565_s2 + $0x70] sm:$0xff] }
   0xb   :  { %130 = vmatpush.msra.mxu2 %v108_v17  ;;  %v367_v1 = vld [vmem:[%s566_s3 + $0x4] ss:$0 sm:$0xff]  ;;  %v368_v4 = vld [vmem:[%s566_s3 + $0x5] ss:$0 sm:$0xff]  ;;  %250 = vmatpush.msrb.mxu0 %v232_v15  ;;  %v292_v47 = vld [vmem:[%s565_s2 + $0x90] sm:$0xff] }
   0xc   :  { %190 = vmatpush.msra.mxu3 %v170_v48  ;;  %v291_v48 = vld [vmem:[%s565_s2 + $0x88] sm:$0xff] }
   0xd   :  { %131 = vmatpush.msra.mxu2 %v107_v18  ;;  %v230_v18 = vld [vmem:[%s565_s2 + $0x68] sm:$0xff]  ;;  %251 = vmatpush.msrb.mxu0 %v231_v16 }
   0xe   :  { %191 = vmatpush.msra.mxu3 %v169_v49 }
   0xf   :  { %252 = vmatpush.msrb.mxu0 %v230_v18 }
  0x10   :  { %192 = vmatpush.msra.mxu3 %v168_v50 }
  0x82   :  { %v45_v7 = vpop.f32.mrf.mxu0  ;;  %v68_v8 = vpop.f32.mrf.mxu1 }
  0x83   :  { %v69_v9 = vadd.f32 %v68_v8, %v45_v7  ;;  %v369_v8 = vld [vmem:[%s566_s3 + $0x6] ss:$0 sm:$0xff] }
  0x85   :  { %v73_v10 = vadd.f32 %v363_v6, %v69_v9 }
  0x87   :  { %v77_v11 = vsel %vm76_vm1, %v73_v10, 0.0  ;;  %v80_v12 = vmul.f32 %v73_v10, %v73_v10 }
  0x88   :  { %78 = vadd.xlane.f32.xlu0 %v77_v11 }
  0x89   :  { %v81_v13 = vsel %vm76_vm1, %v80_v12, 0.0 }
  0x90   :  { %82 = vadd.xlane.f32.xlu0 %v81_v13 }
  0xfb   :  { %v79_v14 = vpop.xlane.xlu0 %78 }
  0xfc   :  { %v84_v19 = vmul.f32 0.03125, %v79_v14 }
  0xfe   :  { %v86_v21 = vmul.f32 %v84_v19, %v84_v19  ;;  %v89_v32 = vsub.f32 %v73_v10, %v84_v19  ;;  %v229_v19 = vld [vmem:[%s565_s2 + $0x60] sm:$0xff] }
  0xff   :  { %253 = vmatpush.msrb.mxu0 %v229_v19 }
 0x103   :  { %v83_v20 = vpop.xlane.xlu0 %82 }
 0x104   :  { %v85_v22 = vmul.f32 0.03125, %v83_v20 }
 0x106   :  { %v87_v23 = vsub.f32 %v85_v22, %v86_v21 }
 0x108   :  { %v88_v24 = vmax.f32 %v87_v23, 0.0 }
 0x10a   :  { %v90_v25 = vadd.f32 1e-05, %v88_v24 }
 0x10c   :  { %376 = vrsqrt.f32 %v90_v25  ;;  %vm97_vm3 = vweird.f32 %v90_v25 }
 0x112   :  { %v377_v26 = vpop.eup %376 }
 0x113   :  { %v92_v27 = vmul.f32 %v377_v26, %v90_v25  ;;  %vm98_vm2 = vweird.f32 %v377_v26 }
 0x114   :  { %vm99_vm4 = vmor %vm97_vm3, %vm98_vm2 }
 0x115   :  { %v93_v28 = vmul.f32 %v377_v26, %v92_v27 }
 0x117   :  { %v94_v29 = vmul.f32 0.5, %v93_v28 }
 0x119   :  { %v95_v30 = vsub.f32 1.5, %v94_v29 }
 0x11b   :  { %v96_v31 = vmul.f32 %v377_v26, %v95_v30 }
 0x11d   :  { %v100_v34 = vsel %vm99_vm4, %v377_v26, %v96_v31 }
 0x11e   :  { %v101_v35 = vmul.f32 %v100_v34, %v89_v32 }
 0x120   :  { %v103_v37 = vmul.f32 %v364_v33, %v101_v35  ;;  %v370_v33 = vld [vmem:[%s566_s3 + $0x7] ss:$0 sm:$0xff] }
 0x122   :  { %v105_v38 = vadd.f32 %v365_v36, %v103_v37  ;;  %v371_v36 = vld [vmem:[%s566_s3 + $0x8] ss:$0 sm:$0xff] }
 0x124   :  { %v106_v39 = vmax.f32 %v105_v38, 0.0 }
 0x126   :  { %357 = vmatmul.msk.f32.vlgmr.msra.gmra.mxu2 %vm76_vm1, %v106_v39 }
 0x1a9   :  { %v133_v41 = vpop.f32.mrf.mxu2 }
 0x1aa   :  { %v134_v42 = vadd.f32 %v366_v40, %v133_v41  ;;  %v372_v40 = vld [vmem:[%s566_s3 + $0x9] ss:$0 sm:$0xff] }
 0x1ac   :  { %v138_v43 = vsel %vm76_vm1, %v134_v42, 0.0  ;;  %v141_v44 = vmul.f32 %v134_v42, %v134_v42 }
 0x1ad   :  { %139 = vadd.xlane.f32.xlu1 %v138_v43 }
 0x1ae   :  { %v142_v45 = vsel %vm76_vm1, %v141_v44, 0.0 }
 0x1b5   :  { %143 = vadd.xlane.f32.xlu1 %v142_v45 }
 0x220   :  { %v140_v46 = vpop.xlane.xlu1 %139 }
 0x221   :  { %v145_v51 = vmul.f32 0.03125, %v140_v46  ;;  %v293_v46 = vld [vmem:[%s565_s2 + $0x98] sm:$0xff] }
 0x222   :  { %311 = vmatpush.msrb.mxu1 %v293_v46 }
 0x223   :  { %v147_v53 = vmul.f32 %v145_v51, %v145_v51  ;;  %v150_v0 = vsub.f32 %v134_v42, %v145_v51  ;;  %v290_v51 = vld [vmem:[%s565_s2 + $0x80] sm:$0xff] }
 0x224   :  { %312 = vmatpush.msrb.mxu1 %v292_v47 }
 0x226   :  { %313 = vmatpush.msrb.mxu1 %v291_v48 }
 0x228   :  { %v144_v52 = vpop.xlane.xlu1 %143  ;;  %314 = vmatpush.msrb.mxu1 %v290_v51 }
 0x229   :  { %v146_v54 = vmul.f32 0.03125, %v144_v52 }
 0x22b   :  { %v148_v55 = vsub.f32 %v146_v54, %v147_v53 }
 0x22d   :  { %v149_v56 = vmax.f32 %v148_v55, 0.0 }
 0x22f   :  { %v151_v57 = vadd.f32 1e-05, %v149_v56 }
 0x231   :  { %378 = vrsqrt.f32 %v151_v57  ;;  %vm158_vm6 = vweird.f32 %v151_v57 }
 0x237   :  { %v379_v58 = vpop.eup %378 }
 0x238   :  { %v153_v59 = vmul.f32 %v379_v58, %v151_v57  ;;  %vm159_vm5 = vweird.f32 %v379_v58 }
 0x239   :  { %vm160_vm7 = vmor %vm158_vm6, %vm159_vm5 }
 0x23a   :  { %v154_v60 = vmul.f32 %v379_v58, %v153_v59 }
 0x23c   :  { %v155_v61 = vmul.f32 0.5, %v154_v60 }
 0x23e   :  { %v156_v62 = vsub.f32 1.5, %v155_v61 }
 0x240   :  { %v157_v63 = vmul.f32 %v379_v58, %v156_v62 }
 0x242   :  { %v161_v2 = vsel %vm160_vm7, %v379_v58, %v157_v63 }
 0x243   :  { %v162_v3 = vmul.f32 %v161_v2, %v150_v0 }
 0x245   :  { %v164_v5 = vmul.f32 %v367_v1, %v162_v3  ;;  %v373_v1 = vld [vmem:[%s566_s3 + $0xa] ss:$0 sm:$0xff] }
 0x247   :  { %v166_v6 = vadd.f32 %v368_v4, %v164_v5  ;;  %v374_v4 = vld [vmem:[%s566_s3 + $0xb] ss:$0 sm:$0xff] }
 0x249   :  { %v167_v7 = vmax.f32 %v166_v6, 0.0 }
 0x24b   :  { %358 = vmatmul.msk.f32.vlgmr.msra.gmra.mxu3 %vm76_vm1, %v167_v7 }
 0x2ce   :  { %v194_v9 = vpop.f32.mrf.mxu3 }
 0x2cf   :  { %v195_v10 = vadd.f32 %v369_v8, %v194_v9  ;;  %v375_v8 = vld [vmem:[%s566_s3 + $0xc] ss:$0 sm:$0xff]  ;;  %s346_s3 = sshll.u32 %s567_s4, 4  ;;  %s347_s3 = int_to_ptr.hbm [resolvable:$true] %s346_s3 }
 0x2d1   :  { %v199_v11 = vsel %vm76_vm1, %v195_v10, 0.0  ;;  %v202_v12 = vmul.f32 %v195_v10, %v195_v10 }
 0x2d2   :  { %200 = vadd.xlane.f32.xlu2 %v199_v11 }
 0x2d3   :  { %v203_v13 = vsel %vm76_vm1, %v202_v12, 0.0 }
 0x2da   :  { %204 = vadd.xlane.f32.xlu2 %v203_v13 }
 0x345   :  { %v201_v14 = vpop.xlane.xlu2 %200 }
 0x346   :  { %v206_v17 = vmul.f32 0.03125, %v201_v14 }
 0x348   :  { %v208_v21 = vmul.f32 %v206_v17, %v206_v17  ;;  %v211_v32 = vsub.f32 %v195_v10, %v206_v17 }
 0x34d   :  { %v205_v20 = vpop.xlane.xlu2 %204 }
 0x34e   :  { %v207_v22 = vmul.f32 0.03125, %v205_v20 }
 0x350   :  { %v209_v23 = vsub.f32 %v207_v22, %v208_v21 }
 0x352   :  { %v210_v24 = vmax.f32 %v209_v23, 0.0 }
 0x354   :  { %v212_v25 = vadd.f32 1e-05, %v210_v24 }
 0x356   :  { %380 = vrsqrt.f32 %v212_v25  ;;  %vm219_vm9 = vweird.f32 %v212_v25 }
 0x35c   :  { %v381_v26 = vpop.eup %380 }
 0x35d   :  { %v214_v27 = vmul.f32 %v381_v26, %v212_v25  ;;  %vm220_vm8 = vweird.f32 %v381_v26 }
 0x35e   :  { %vm221_vm10 = vmor %vm219_vm9, %vm220_vm8 }
 0x35f   :  { %v215_v28 = vmul.f32 %v381_v26, %v214_v27 }
 0x361   :  { %v216_v29 = vmul.f32 0.5, %v215_v28 }
 0x363   :  { %v217_v30 = vsub.f32 1.5, %v216_v29 }
 0x365   :  { %v218_v31 = vmul.f32 %v381_v26, %v217_v30 }
 0x367   :  { %v222_v34 = vsel %vm221_vm10, %v381_v26, %v218_v31 }
 0x368   :  { %v223_v35 = vmul.f32 %v222_v34, %v211_v32 }
 0x36a   :  { %v225_v37 = vmul.f32 %v370_v33, %v223_v35 }
 0x36c   :  { %v227_v38 = vadd.f32 %v371_v36, %v225_v37 }
 0x36e   :  { %v228_v39 = vmax.f32 %v227_v38, 0.0 }
 0x370   :  { %359 = vmatmul.msk.f32.vlgmr.msrb.gmra.mxu0 %vm76_vm1, %v228_v39 }
 0x3ed   :  { %v255_v41 = vpop.f32.mrf.mxu0 }
 0x3ee   :  { %v256_v42 = vadd.f32 %v372_v40, %v255_v41 }
 0x3f0   :  { %v260_v43 = vsel %vm76_vm1, %v256_v42, 0.0  ;;  %v263_v44 = vmul.f32 %v256_v42, %v256_v42 }
 0x3f1   :  { %261 = vadd.xlane.f32.xlu0 %v260_v43 }
 0x3f2   :  { %v264_v45 = vsel %vm76_vm1, %v263_v44, 0.0 }
 0x3f3   :  { %265 = vadd.xlane.f32.xlu1 %v264_v45 }
 0x464   :  { %v262_v49 = vpop.xlane.xlu0 %261 }
 0x465   :  { %v267_v50 = vmul.f32 0.03125, %v262_v49 }
 0x466   :  { %v266_v52 = vpop.xlane.xlu1 %265 }
 0x467   :  { %v269_v53 = vmul.f32 %v267_v50, %v267_v50  ;;  %v268_v54 = vmul.f32 0.03125, %v266_v52  ;;  %v272_v0 = vsub.f32 %v256_v42, %v267_v50 }
 0x469   :  { %v270_v55 = vsub.f32 %v268_v54, %v269_v53 }
 0x46b   :  { %v271_v56 = vmax.f32 %v270_v55, 0.0 }
 0x46d   :  { %v273_v57 = vadd.f32 1e-05, %v271_v56 }
 0x46f   :  { %382 = vrsqrt.f32 %v273_v57  ;;  %vm280_vm12 = vweird.f32 %v273_v57 }
 0x475   :  { %v383_v58 = vpop.eup %382 }
 0x476   :  { %v275_v59 = vmul.f32 %v383_v58, %v273_v57  ;;  %vm281_vm11 = vweird.f32 %v383_v58 }
 0x477   :  { %vm282_vm13 = vmor %vm280_vm12, %vm281_vm11 }
 0x478   :  { %v276_v60 = vmul.f32 %v383_v58, %v275_v59 }
 0x47a   :  { %v277_v61 = vmul.f32 0.5, %v276_v60 }
 0x47c   :  { %v278_v62 = vsub.f32 1.5, %v277_v61 }
 0x47e   :  { %v279_v63 = vmul.f32 %v383_v58, %v278_v62 }
 0x480   :  { %v283_v2 = vsel %vm282_vm13, %v383_v58, %v279_v63 }
 0x481   :  { %v284_v3 = vmul.f32 %v283_v2, %v272_v0 }
 0x483   :  { %v286_v5 = vmul.f32 %v373_v1, %v284_v3 }
 0x485   :  { %v288_v6 = vadd.f32 %v374_v4, %v286_v5 }
 0x487   :  { %v289_v7 = vmax.f32 %v288_v6, 0.0 }
 0x489   :  { %360 = vmatmul.msk.f32.vlgmr.msrb.gmra.mxu1 %vm76_vm1, %v289_v7 }
 0x506   :  { %v316_v9 = vpop.f32.mrf.mxu1 }
 0x507   :  { %v317_v10 = vadd.f32 %v375_v8, %v316_v9 }
 0x509   :  { %v361_v11 = vmul.f32 -1.442695, %v317_v10 }
 0x50b   :  { %384 = vpow2.f32 %v361_v11 }
 0x511   :  { %v385_v12 = vpop.eup %384 }
 0x512   :  { %v322_v13 = vadd.f32 1.0, %v385_v12 }
 0x514   :  { %386 = vrcp.f32 %v322_v13  ;;  %v334_v17 = vand.u32 2147483648, %v322_v13  ;;  %v332_v19 = vand.u32 2147483647, %v322_v13  ;;  %vm328_vm15 = vweird.f32 %v322_v13 }
 0x516   :  { %v335_v21 = vor.u32 1.1754944e-38, %v334_v17  ;;  %vm333_vm2 = vcmp.eq.f32.partialorder %v332_v19, 8.507059e+37 }
 0x51a   :  { %v387_v14 = vpop.eup %386 }
 0x51b   :  { %v324_v15 = vmul.f32 %v387_v14, %v322_v13  ;;  %vm329_vm14 = vweird.f32 %v387_v14 }
 0x51c   :  { %vm330_vm1 = vmor %vm328_vm15, %vm329_vm14 }
 0x51d   :  { %v325_v16 = vsub.f32 1.0, %v324_v15 }
 0x51f   :  { %v326_v18 = vmul.f32 %v387_v14, %v325_v16 }
 0x521   :  { %v327_v20 = vadd.f32 %v387_v14, %v326_v18 }
 0x523   :  { %v331_v22 = vsel %vm330_vm1, %v387_v14, %v327_v20 }
 0x524   :  { %v336_v23 = vsel %vm333_vm2, %v335_v21, %v331_v22 }
 0x525   :  { %338 = vst.msk [vmem:[#allocation2] sm:$0xff] %vm24_vm0, %v336_v23 }
 0x526   :  { %349 = dma.vmem_to_hbm [thread:$0]  %s345_s0, 128, %s347_s3, [#allocation3]  }
 0x527   :  { %412 = dma.done.wait [#allocation3], 128  }
 0x528   :  { %413 = vsyncadd [#allocation3], 4294967168 }
 0x529   :  { %354 = vsyncpa [#allocation3], 1 }

</bundles_post_ra>
